<compile_context>
chip_gen: v7x
topology: tpu7x:2x2x1
jax: 0.10.0
libtpu: 0.0.40
codegen_flags: <defaults>
</compile_context>

<pallas_src>
import jax
import jax.numpy as jnp
from jax.experimental import pallas as pl
from jax.experimental.pallas import tpu as pltpu


# --------------------------------- kernels ----------------------------------

def _conv1x1_bn_relu_kernel(x_ref, w_ref, b_ref, o_ref):
    # x_ref: (Cin, THW)  activation tile (original dtype), lanes = spatial positions
    # w_ref: (Cout, Cin) conv weight with BN scale folded in (compute dtype)
    # b_ref: (Cout, 1)   folded BN bias = beta - mean * scale (f32)
    # o_ref: (Cout, THW)
    x = x_ref[...].astype(w_ref.dtype)          # in-kernel cast: no wrapper HBM pass
    y = jnp.dot(w_ref[...], x, preferred_element_type=jnp.float32)
    o_ref[...] = jnp.maximum(y + b_ref[...], 0.0).astype(o_ref.dtype)


def _conv1x1_bn_relu_ksplit_kernel(x_ref, w_ref, b_ref, o_ref, acc_ref):
    # Channel-blocked variant: grid = (N, HW tiles, K tiles); K is last / "arbitrary".
    k = pl.program_id(2)

    @pl.when(k == 0)
    def _():
        acc_ref[...] = jnp.zeros_like(acc_ref)

    x = x_ref[...].astype(w_ref.dtype)
    acc_ref[...] += jnp.dot(w_ref[...], x, preferred_element_type=jnp.float32)

    @pl.when(k == pl.num_programs(2) - 1)
    def _():
        o_ref[...] = jnp.maximum(acc_ref[...] + b_ref[...], 0.0).astype(o_ref.dtype)


# --------------------------------- wrapper ----------------------------------

def conv1x1_bn_relu(x_nchw, weight, gamma, beta, running_mean, running_var,
                    *, stride=1, eps=1e-5,
                    compute_dtype=jnp.bfloat16,   # MXU dtype (None = keep x dtype)
                    out_dtype=None,               # None = same dtype as x; bf16 halves stores
                    max_tile_hw=8192,
                    max_tile_k=None,              # cap the Cin block (forces a K split)
                    vmem_budget_bytes=None):
    """1x1 conv (groups=1, no bias) + BatchNorm2d (eval) + ReLU, NCHW in/out."""
    # TODO(synk): groups > 1 not implemented (module default groups=1).
    if stride != 1:
        # TODO(synk): fold stride into the kernel index_map / a manual strided DMA so
        # strided layers don't pay this extra HBM gather pass.
        x_nchw = x_nchw[:, :, ::stride, ::stride]

    N, Cin, H, W = x_nchw.shape
    Cout = weight.shape[0]
    HW = H * W
    out_dtype = x_nchw.dtype if out_dtype is None else jnp.dtype(out_dtype)
    w_dtype = x_nchw.dtype if compute_dtype is None else jnp.dtype(compute_dtype)

    # ---- fold eval-mode BN into the weight columns / a per-channel bias (f32 math) ----
    scale = (gamma.astype(jnp.float32) /
             jnp.sqrt(running_var.astype(jnp.float32) + eps))                   # (Cout,)
    w_mat = (weight.reshape(Cout, Cin).astype(jnp.float32)
             * scale[:, None]).astype(w_dtype)                                  # (Cout, Cin)
    bias = (beta.astype(jnp.float32)
            - running_mean.astype(jnp.float32) * scale).reshape(Cout, 1)        # f32

    # Free reshape (no transpose); activation kept in its ORIGINAL dtype -- the cast to
    # compute dtype happens per-tile inside the kernel.
    x_flat = x_nchw.reshape(N, Cin, HW)

    x_sz = x_flat.dtype.itemsize
    o_sz = jnp.dtype(out_dtype).itemsize
    w_sz = jnp.dtype(w_dtype).itemsize
    w_bytes = Cout * Cin * w_sz

    # ---- generation-aware VMEM budget (v5e/v6e: 128 MiB, v7x: 64 MiB per TC) ----
    if vmem_budget_bytes is None:
        try:
            cap = int(getattr(pltpu.get_tpu_info(), "vmem_capacity_bytes", 0)) or (64 << 20)
        except Exception:
            cap = 64 << 20                      # conservative fallback (v7x per-TC)
        vmem_budget_bytes = (3 * cap) // 4      # ~96 MiB on v5e/v6e, ~48 MiB on v7x
    vmem_budget_bytes = int(vmem_budget_bytes)

    # Per-lane-column VMEM cost: double-buffered x tile + double-buffered output tile
    # + the f32 matmul / epilogue intermediate (counted twice, conservatively).
    def _max_hw_tile(kb, w_bufs):
        per_col = 2 * kb * x_sz + 2 * Cout * o_sz + 2 * Cout * 4
        fixed = w_bufs * Cout * kb * w_sz + 2 * Cout * 4 + (1 << 20)   # weight, bias, slack
        return max((vmem_budget_bytes - fixed) // per_col, 128)

    # ---- channel (reduction) block: full Cin unless VMEM (or max_tile_k) forces a split
    w_bufs_full = 1 if w_bytes > (1 << 20) else 2   # big constant weight -> single-buffer
    # TODO(synk): per review pl.Buffered(1) could be applied unconditionally (and to the
    # bias); kept thresholded since the VMEM saving only matters for MiB-scale weights.
    cand = [c for c in dict.fromkeys([max_tile_k or 0, 1024, 512, 256, 128])
            if c and c < Cin and Cin % c == 0 and c % 8 == 0]
    if max_tile_k is not None:
        cand = [c for c in cand if c <= max_tile_k]
    cand.sort(reverse=True)
    need_split = ((max_tile_k is not None and max_tile_k < Cin)
                  or _max_hw_tile(Cin, w_bufs_full) < 512)
    tile_k = Cin
    if need_split and cand:
        tile_k = next((c for c in cand if _max_hw_tile(c, 2) >= 512), cand[-1])
    split_k = tile_k < Cin

    # ---- spatial (lane) tile: biggest 128/512-multiple fitting the budget ----
    HW_128 = ((HW + 127) // 128) * 128
    raw = _max_hw_tile(tile_k, 2 if split_k else w_bufs_full)
    tile_hw = min(int(max_tile_hw), int(raw))
    if HW <= 128:
        tile_hw = HW                       # short axis: one block == full dim (legal)
    elif tile_hw >= HW_128:
        tile_hw = HW_128                   # one (possibly masked) tile per image
    elif tile_hw >= 512:
        tile_hw = (tile_hw // 512) * 512   # keep big tiles 512-aligned
    else:
        tile_hw = max(128, (tile_hw // 128) * 128)

    # v7x has two TensorCores sharing the "parallel" grid axes -> make sure there are
    # at least two parallel steps so one core is never idle.
    if N * pl.cdiv(HW, tile_hw) < 2 and HW > 128:
        tile_hw = min(tile_hw, (((HW + 1) // 2 + 127) // 128) * 128)

    num_hw = pl.cdiv(HW, tile_hw)   # ragged HW -> masked last block (no jnp.pad / slice)

    # TODO(synk): on v5e, pad Cin/Cout to 128-multiples at init for large layers that
    # become MXU-bound; and consider pltpu.matmul_push_rhs to keep the weight stationary.

    cost = pl.CostEstimate(
        flops=2 * N * HW * Cin * Cout,
        transcendentals=0,
        bytes_accessed=int(N * Cin * HW * x_sz + w_bytes + Cout * 4 + N * Cout * HW * o_sz),
    )
    cparams = dict(vmem_limit_bytes=vmem_budget_bytes)

    if not split_k:
        w_kwargs = {"pipeline_mode": pl.Buffered(1)} if w_bufs_full == 1 else {}
        out = pl.pallas_call(
            _conv1x1_bn_relu_kernel,
            out_shape=jax.ShapeDtypeStruct((N, Cout, HW), out_dtype),
            grid=(N, num_hw),
            in_specs=[
                pl.BlockSpec((None, Cin, tile_hw), lambda n, j: (n, 0, j)),   # x tile
                pl.BlockSpec((Cout, Cin), lambda n, j: (0, 0), **w_kwargs),   # resident weight
                pl.BlockSpec((Cout, 1), lambda n, j: (0, 0)),                 # folded bias
            ],
            out_specs=pl.BlockSpec((None, Cout, tile_hw), lambda n, j: (n, 0, j)),
            compiler_params=pltpu.CompilerParams(
                dimension_semantics=("parallel", "parallel"), **cparams),
            cost_estimate=cost,
        )(x_flat, w_mat, bias)
    else:
        nk = Cin // tile_k
        out = pl.pallas_call(
            _conv1x1_bn_relu_ksplit_kernel,
            out_shape=jax.ShapeDtypeStruct((N, Cout, HW), out_dtype),
            grid=(N, num_hw, nk),
            in_specs=[
                pl.BlockSpec((None, tile_k, tile_hw), lambda n, j, k: (n, k, j)),
                pl.BlockSpec((Cout, tile_k), lambda n, j, k: (0, k)),
                pl.BlockSpec((Cout, 1), lambda n, j, k: (0, 0)),
            ],
            out_specs=pl.BlockSpec((None, Cout, tile_hw), lambda n, j, k: (n, 0, j)),
            scratch_shapes=[pltpu.VMEM((Cout, tile_hw), jnp.float32)],
            compiler_params=pltpu.CompilerParams(
                dimension_semantics=("parallel", "parallel", "arbitrary"), **cparams),
            cost_estimate=cost,
        )(x_flat, w_mat, bias)

    return out.reshape(N, Cout, H, W)


def reference(x_nchw, weight, gamma, beta, running_mean, running_var, eps=1e-5):
    # pure-JAX reference of the same forward pass (eval-mode BN)
    y = jnp.einsum("nchw,oc->nohw", x_nchw, weight.reshape(weight.shape[0], -1))
    scale = gamma / jnp.sqrt(running_var + eps)
    bias = beta - running_mean * scale
    y = y * scale[None, :, None, None] + bias[None, :, None, None]
    return jnp.maximum(y, 0.0)


if __name__ == "__main__":
    key = jax.random.PRNGKey(0)

    # ---- test 1: module-scale shapes (N=2, Cin=4, Cout=8, 16x16) ----
    N, Cin, H, W = 2, 4, 16, 16
    Cout = 8
    kx, kw, kg, kb = jax.random.split(key, 4)
    x = jax.random.normal(kx, (N, Cin, H, W), dtype=jnp.float32)
    weight = jax.random.normal(kw, (Cout, Cin, 1, 1), dtype=jnp.float32) * 0.1
    gamma = jnp.ones((Cout,), jnp.float32) + 0.1 * jax.random.normal(kg, (Cout,))
    beta = 0.1 * jax.random.normal(kb, (Cout,), dtype=jnp.float32)
    running_mean = 0.05 * jnp.arange(Cout, dtype=jnp.float32)
    running_var = jnp.ones((Cout,), jnp.float32) + 0.01 * jnp.arange(Cout, dtype=jnp.float32)

    ref = reference(x, weight, gamma, beta, running_mean, running_var)

    # Exact f32 compute path.
    out_f32 = conv1x1_bn_relu(x, weight, gamma, beta, running_mean, running_var,
                              compute_dtype=jnp.float32)
    out_f32 = jax.block_until_ready(out_f32)
    assert out_f32.shape == (N, Cout, H, W), out_f32.shape
    assert jnp.allclose(out_f32, ref, atol=1e-5, rtol=1e-5), \
        float(jnp.abs(out_f32 - ref).max())

    # Default bf16 compute path with bf16 output (in-kernel cast, half store traffic).
    out_bf16 = conv1x1_bn_relu(x, weight, gamma, beta, running_mean, running_var,
                               out_dtype=jnp.bfloat16)
    out_bf16 = jax.block_until_ready(out_bf16)
    assert out_bf16.shape == (N, Cout, H, W) and out_bf16.dtype == jnp.bfloat16
    assert jnp.allclose(out_bf16.astype(jnp.float32), ref, atol=7e-2, rtol=7e-2), \
        float(jnp.abs(out_bf16.astype(jnp.float32) - ref).max())

    # ---- test 2: exercise the channel-blocked (K-split) accumulator path ----
    N2, Cin2, Cout2, H2, W2 = 1, 256, 64, 16, 16
    k1, k2 = jax.random.split(jax.random.PRNGKey(1))
    x2 = jax.random.normal(k1, (N2, Cin2, H2, W2), dtype=jnp.float32)
    w2 = jax.random.normal(k2, (Cout2, Cin2, 1, 1), dtype=jnp.float32) * 0.05
    g2 = jnp.ones((Cout2,), jnp.float32)
    b2 = jnp.zeros((Cout2,), jnp.float32)
    m2 = jnp.zeros((Cout2,), jnp.float32)
    v2 = jnp.ones((Cout2,), jnp.float32)
    ref2 = reference(x2, w2, g2, b2, m2, v2)
    out2 = conv1x1_bn_relu(x2, w2, g2, b2, m2, v2, max_tile_k=128)   # forces K split
    out2 = jax.block_until_ready(out2)
    assert out2.shape == (N2, Cout2, H2, W2), out2.shape
    assert jnp.allclose(out2, ref2, atol=5e-2, rtol=5e-2), \
        float(jnp.abs(out2 - ref2).max())

    print("KERNEL_OK")
</pallas_src>

<mosaic_0001>
module attributes {stable_mosaic.version = 11 : i64} {
  func.func @_conv1x1_bn_relu_kernel(%arg0: i32, %arg1: i32, %arg2: memref<1x4x256xf32, #tpu.memory_space<vmem>>, %arg3: memref<8x4xf32, #tpu.memory_space<vmem>>, %arg4: memref<8x1xf32, #tpu.memory_space<vmem>>, %arg5: memref<1x8x256xf32, #tpu.memory_space<vmem>>) attributes {dimension_semantics = [#tpu.dimension_semantics<parallel>, #tpu.dimension_semantics<parallel>], iteration_bounds = array<i64: 2, 1>, scalar_prefetch = 0 : i64, scratch_operands = 0 : i64, tpu.core_type = #tpu.core_type<tc>, window_params = [{transform_indices = @transform_0, window_bounds = array<i64: 1, 4, 256>}, {pipeline_mode = #tpu.pipeline_mode<synchronous>, transform_indices = @transform_1, window_bounds = array<i64: 8, 4>}, {pipeline_mode = #tpu.pipeline_mode<synchronous>, transform_indices = @transform_2, window_bounds = array<i64: 8, 1>}, {transform_indices = @transform_3, window_bounds = array<i64: 1, 8, 256>}]} {
    %c0 = arith.constant 0 : index
    %c0_0 = arith.constant 0 : index
    %c0_1 = arith.constant 0 : index
    %0 = vector.load %arg2[%c0, %c0_0, %c0_1] : memref<1x4x256xf32, #tpu.memory_space<vmem>>, vector<1x4x256xf32>
    %1 = vector.shape_cast %0 : vector<1x4x256xf32> to vector<4x256xf32>
    %c0_2 = arith.constant 0 : index
    %c0_3 = arith.constant 0 : index
    %2 = vector.load %arg3[%c0_2, %c0_3] : memref<8x4xf32, #tpu.memory_space<vmem>>, vector<8x4xf32>
    %cst = arith.constant dense<0.000000e+00> : vector<8x256xf32>
    %3 = tpu.matmul %2, %1, %cst {dimension_numbers = #tpu.dot_dimension_numbers<[1], [0], [0], [1], [0, 0, 1, 1], [], []>} : vector<8x4xf32>, vector<4x256xf32>, vector<8x256xf32> -> vector<8x256xf32>
    %c0_4 = arith.constant 0 : index
    %c0_5 = arith.constant 0 : index
    %4 = vector.load %arg4[%c0_4, %c0_5] : memref<8x1xf32, #tpu.memory_space<vmem>>, vector<8x1xf32>
    %5 = vector.broadcast %4 : vector<8x1xf32> to vector<8x256xf32>
    %6 = arith.addf %3, %5 : vector<8x256xf32>
    %cst_6 = arith.constant 0.000000e+00 : f32
    %7 = vector.broadcast %cst_6 : f32 to vector<8x256xf32>
    %8 = arith.maximumf %6, %7 : vector<8x256xf32>
    %c0_7 = arith.constant 0 : index
    %c0_8 = arith.constant 0 : index
    %c0_9 = arith.constant 0 : index
    %9 = vector.load %arg5[%c0_7, %c0_8, %c0_9] : memref<1x8x256xf32, #tpu.memory_space<vmem>>, vector<1x8x256xf32>
    %10 = vector.shape_cast %9 : vector<1x8x256xf32> to vector<8x256xf32>
    %11 = vector.shape_cast %8 : vector<8x256xf32> to vector<1x8x256xf32>
    tpu.vector_store %arg5[%c0_7, %c0_8, %c0_9], %11 {strides = array<i32>} : memref<1x8x256xf32, #tpu.memory_space<vmem>>, vector<1x8x256xf32>,
    return
  }
  func.func @transform_0(%arg0: i32, %arg1: i32) -> (i32, i32, i32) {
    %c0_i32 = arith.constant 0 : i32
    %c0_i32_0 = arith.constant 0 : i32
    return %arg0, %c0_i32, %arg1 : i32, i32, i32
  }
  func.func @transform_1(%arg0: i32, %arg1: i32) -> (i32, i32) {
    %c0_i32 = arith.constant 0 : i32
    %c0_i32_0 = arith.constant 0 : i32
    %c0_i32_1 = arith.constant 0 : i32
    return %c0_i32, %c0_i32_0 : i32, i32
  }
  func.func @transform_2(%arg0: i32, %arg1: i32) -> (i32, i32) {
    %c0_i32 = arith.constant 0 : i32
    %c0_i32_0 = arith.constant 0 : i32
    %c0_i32_1 = arith.constant 0 : i32
    return %c0_i32, %c0_i32_0 : i32, i32
  }
  func.func @transform_3(%arg0: i32, %arg1: i32) -> (i32, i32, i32) {
    %c0_i32 = arith.constant 0 : i32
    %c0_i32_0 = arith.constant 0 : i32
    return %arg0, %c0_i32, %arg1 : i32, i32, i32
  }
}

</mosaic_0001>

<bundles_post_ra>
// kernel: tpu_custom_call.1
= control target key start
LH: loop header
LB: loop body
LE: loop exit
PB: predicated region body
PF: predicated region fallthrough
CT: control target
= control target key end

     0   :  { %8 = vsyncpa [#allocation3], 0  ;;  %s685_s0 = inlined_call_operand.vmem [shape: f32[2,4,256], index: 0, kind: input, shape index: {}]   ;;  %s686_s1 = inlined_call_operand.vmem [shape: f32[8,4], index: 1, kind: input, shape index: {}]   ;;  %s687_s2 = inlined_call_operand.vmem [shape: f32[8,1], index: 2, kind: input, shape index: {}]   ;;  %s688_s3 = inlined_call_operand.hbm [shape: f32[2,8,256], index: 3, kind: output, shape index: {}]  }
   0x1   :  { %10 = vsyncpa [#allocation3 + $0x1], 0  ;;  %s567_s12 = smov 0   ;;  %s569_s13 = smov 0  }
   0x2   :  { %s571_s14 = smov 0   ;;  %s573_s15 = smov 0  }
   0x3   :  { %s575_s16 = smov 0   ;;  %s577_s17 = smov 0  }
   0x4 LB: > { %s387_s18 = sadd.s32 4294967295, %s542_s17   ;;  %s388_s19 = sadd.s32 4294967294, %s542_s17   ;;  %s542_s17 = sphi %s577_s17, %s16_s17   ;;  %s538_s16 = sphi %s575_s16, %s695_s16   ;;  %s534_s15 = sphi %s573_s15, %s694_s15   ;;  %s530_s14 = sphi %s571_s14, %s693_s14   ;;  %s526_s13 = sphi %s569_s13, %s692_s13   ;;  %s522_s12 = sphi %s567_s12, %s691_s12  }
   0x5   : > { %s28_s20 = sadd.s32 1, %s538_s16  ;;  %s107_s21 = sadd.s32 1, %s530_s14 }
   0x6   : > { %p30_p0 = scmp.ge.s32.totalorder %s28_s20, 2  ;;  %p117_p1 = scmp.ne.s32.totalorder %s530_s14, %s526_s13 }
   0x7   : > { %p118_p2 = scmp.eq.s32.totalorder %s387_s18, 1  ;;  %p123_p3 = scmp.ne.s32.totalorder %s526_s13, %s522_s12 }
   0x8   : > { %s697_s20 = smov (%p30_p0, %s28_s20), 0  ;;  %p124_p5 = scmp.eq.s32.totalorder %s388_s19, 1 }
   0x9   : > { %p607_p4 = por %p118_p2, %p117_p1  ;;  %s102_s23 = ssub.s32 %s538_s16, %s697_s20 }
   0xa   : > { %p391_p6 = scmp.ge.s32.totalorder %s542_s17, 1  ;;  %p105_p7 = scmp.eq.s32.totalorder %s102_s23, 0 }
   0xb   : > { %p614_p8 = por %p124_p5, %p123_p3  ;;  %p161_p9 = scmp.lt.s32.totalorder %s542_s17, 3 }
   0xc   : > { %s620_s25 = scalar_select %p105_p7, %s530_s14, %s107_s21  }
   0xd   : > { %p162_p10 = pnand %p391_p6, %p161_p9 }
   0xe   : > { %p190_p11 = scmp.lt.s32.totalorder (!%p162_p10), %s534_s15, 1  ;;  %v544_v0 = vmov (!%p162_p10), 0.0   ;;  %v545_v1 = vmov (!%p162_p10), 0   ;;  %v202_v2 = vld [vmem:[%s687_s2] sm:$0xff] (!%p162_p10)  ;;  %vm214_vm0 = vcmask (!%p162_p10), 1043456   ;;  %vm210_vm1 = vcmask (!%p162_p10), 31744  }
   0xf   : > { %165 = sbr.rel (%p162_p10) target bundleno = 262 (0x106), region = 32  ;;  %283 = vmatprep.mubr.f32.mxu0 (!%p162_p10), %v544_v0  ;;  %462 = vset.pattern.permute.xlu0 (!%p162_p10), %v545_v1  ;;  %v201_v5 = vld [vmem:[%s686_s1] sm:$0xff] (!%p162_p10)  ;;  %s186_s8 = sand.u32 (!%p162_p10), 1, %s526_s13  }
  0x10   : > { %205 = vperm.xlu0 (!%p162_p10), %462, %v202_v2   ;;  %s392_s9 = sshll.u32 (!%p162_p10), %s186_s8, 4  ;;  %s404_s10 = sshll.u32 (!%p162_p10), %s534_s15, 8 }
  0x11   : > { %s188_s11 = scalar_lea.vmem (!%p162_p10), [#allocation2], %s392_s9  ;;  %s638_s23 = scalar_lea.hbm (!%p162_p10), %s688_s3, %s404_s10 }
  0x12   : > { %s311_s18 = sshll.u32 (!%p162_p10), %s188_s11, 4  ;;  %s295_s26 = scalar_lea.sflag (!%p162_p10), [#allocation3], %s186_s8  ;;  %s640_s18 = int_to_ptr.vmem [resolvable:$true] %s311_s18 }
  0x13   : > { %s464_s27 = scalar_lea.vmem (!%p162_p10), %s640_s18, 256 }
  0x14   : > { %p465_p12 = scmp.ne.s32.totalorder (!%p162_p10), %s640_s18, %s464_s27 }
  0x16   : > { %s191_s28 = scalar_select %p190_p11, %s534_s15, 1 }
  0x17   : > { %p466_p13 = pnand %p465_p12, %p607_p4  ;;  %s546_s15 = smov [#allocation2]  }
  0x18   : > { %s403_s29 = sshll.u32 %s191_s28, 3  ;;  %s468_s28 = sshll.u32 %s546_s15, 4  ;;  %s469_s28 = int_to_ptr.vmem [resolvable:$false] %s468_s28 }
  0x19   : > { %s197_s5 = scalar_lea.vmem %s685_s0, %s403_s29  ;;  %p467_p0 = pneg %p466_p13 }
  0x1a   : > { %v200_v3 = vld [vmem:[%s197_s5] sm:$0xff]  ;;  %s470_s29 = scalar_lea.vmem %s469_s28, 512  ;;  %p471_p1 = scmp.lt.s32.totalorder %s640_s18, %s469_s28 }
  0x1b   : > { %v209_v4 = vcombine.high %v200_v3, %v200_v3  ;;  %p472_p2 = scmp.lt.s32.totalorder %s470_s29, %s464_s27 }
  0x1d   : > { %395 = vmatprep.subr.msk.mxu0 %vm214_vm0, %v209_v4  ;;  %p473_p3 = por %p472_p2, %p471_p1 }
  0x1e   : > { %396 = vmatpush1.msk.msra.mxu0 %vm214_vm0, %v200_v3 }
  0x1f   : > { %397 = vmatmul.mubr.msk.f32.vlgmr.msra.gmra.mrb[0].mxu0 %vm210_vm1, %v201_v5  ;;  %p474_p5 = pnand %p473_p3, %p467_p0 }
  0x8f   : > { %v206_v6 = vpop.permute.xlu0 %205 }
  0xf2   : > { %v285_v7 = vpop.f32.mrb[0].mxu0 }
  0xf3   : > { %v286_v8 = vadd.f32 %v285_v7, %v206_v6  ;;  %v287_v9 = vpop.f32.mrb[1].mxu0 }
  0xf4   : > { %v288_v10 = vadd.f32 %v287_v9, %v206_v6 }
  0xf5   : > { %v290_v11 = vmax.f32 %v286_v8, 0.0 }
  0xf6   : > { %v291_v12 = vmax.f32 %v288_v10, 0.0 }
  0xf7   : > { %292 = vst [vmem:[%s188_s11] sm:$0xff] %v290_v11 }
  0xf8   : > { %293 = vst [vmem:[%s188_s11 + $0x8] sm:$0xff] %v291_v12 }
  0xf9   : > { %477 = shalt.err (!%p474_p5)
}
  0xfa   : > { %s478_s30 = scalar_lea.hbm %s638_s23, 256  ;;  %s482_s6 = scalar_lea.hbm %s688_s3, 512 }
  0xfb   : > { %p479_p6 = scmp.ne.s32.totalorder %s638_s23, %s478_s30  ;;  %p483_p10 = scmp.lt.u32.totalorder %s638_s23, %s688_s3 }
  0xfc   : > { %p484_p11 = scmp.lt.u32.totalorder %s482_s6, %s478_s30  ;;  %p486_p13 = scmp.lt.u32.totalorder %s478_s30, %s638_s23 }
  0xfd   : > { %p480_p7 = pnand %p479_p6, %p607_p4 }
  0xfe   : > { %p485_p12 = por %p484_p11, %p483_p10 }
  0xff   : > { %p481_p9 = pneg %p480_p7 }
 0x100   : > { %p487_p0 = por %p486_p13, %p485_p12 }
 0x102   : > { %p488_p1 = pnand %p487_p0, %p481_p9 }
 0x104   : > { %491 = shalt.err (!%p488_p1)
}
 0x105   : > { %405 = dma.vmem_to_hbm [thread:$0]  (%p607_p4), %s640_s18, 256, %s638_s23, %s295_s26  }
 0x106 PF: > { %p411_p2 = scmp.ge.s32.totalorder %s542_s17, 2  ;;  %s323_s9 = sand.u32 1, %s522_s12  }
 0x107   : > { %s324_s10 = scalar_lea.sflag [#allocation3], %s323_s9 }
 0x108   : > { %p408_p3 = pnand %p411_p2, %p614_p8 }
 0x10a   : > { %517 = dma.done.wait (!%p408_p3), %s324_s10, 256  }
 0x10b   : > { %519 = vsyncadd (!%p408_p3), %s324_s10, 4294967040  ;;  %s16_s17 = sadd.s32 1, %s542_s17   ;;  %s691_s12 = smov %s526_s13 }
 0x10c   : > { %p13_p5 = scmp.ge.s32.totalorder %s16_s17, 4   ;;  %s692_s13 = smov %s530_s14 }
 0x10d   : > { %s693_s14 = smov %s620_s25  ;;  %s694_s15 = smov %s538_s16 }
 0x10e   : > { %s695_s16 = smov %s697_s20  ;;  %15 = sbr.rel (!%p13_p5) target bundleno = 4 (0x4), region = 67 }
 0x115   :  { %329 = vsyncpa [#allocation3], 1 }
 0x116   :  { %331 = vsyncpa [#allocation3 + $0x1], 1 }

</bundles_post_ra>
